<compile_context>
chip_gen: v7x
topology: tpu7x:2x2x1
jax: 0.10.0
libtpu: 0.0.40
codegen_flags: <defaults>
</compile_context>

<pallas_src>
import math

import jax
import jax.numpy as jnp
from jax.experimental import pallas as pl
from jax.experimental.pallas import tpu as pltpu

D_IN = 784
LANES = 128          # lane-dense output width (>= D_out = 10)
TB_CAP = 4096        # absolute batch-tile cap (28.5 MB footprint @ f32 x)
VMEM_LIMIT = 48 * 1024 * 1024   # safe on all gens (<= 64 MiB v7x physical)


def _round_up(n, m):
    return ((n + m - 1) // m) * m


def _round_down(n, m):
    return (n // m) * m


def _vmem_capacity_bytes(default=64 << 20):
    """Per-generation physical VMEM; falls back if the query is unavailable."""
    try:
        return int(pltpu.get_tpu_info().vmem_capacity_bytes)
    except Exception:
        return default


def _choose_tb(batch):
    """Pick the batch tile.

    Large tiles amortize per-step overhead (v5e/v6e), but we keep >= 2 grid
    steps so v7x's second TensorCore has work to shard.
    """
    # Per-row VMEM footprint: double-buffered f32 x tile + double-buffered
    # bf16 output tile (resident weight/bias add a fixed ~0.4 MB on top).
    per_row = 2 * (D_IN * 4) + 2 * (LANES * 2)
    budget = _vmem_capacity_bytes() // 2            # ~half of physical VMEM
    tb_cap = max(256, min(TB_CAP, _round_down(budget // per_row, 8)))
    tb = _round_up(pl.cdiv(batch, 2), 8)            # aim for >= 2 grid steps
    return max(8, min(tb, tb_cap))


def _linear_kernel(x_ref, w_ref, b_ref, o_ref):
    # x_ref: (TB, 784) f32 (or bf16), w_ref: (784, 128) bf16,
    # b_ref: (1, 128) f32, o_ref: (TB, 128) bf16.
    # Cast rides along with the DMA-bound x stream (VPU op, effectively free).
    x = x_ref[...].astype(jnp.bfloat16)
    acc = jnp.dot(x, w_ref[...], preferred_element_type=jnp.float32)
    o_ref[...] = (acc + b_ref[...]).astype(o_ref.dtype)   # bf16 store


def pack_linear_params(weight, bias):
    """One-time packing of PyTorch-convention nn.Linear params.

    weight: (10, 784) f32  ->  (784, 128) bf16, zero-padded output lanes
    bias:   (10,)     f32  ->  (1, 128)   f32,  zero-padded output lanes
    """
    d_out, d_in = weight.shape
    w_t = weight.T.astype(jnp.bfloat16)                       # (784, 10)
    w_packed = jnp.zeros((d_in, LANES), jnp.bfloat16).at[:, :d_out].set(w_t)
    b_packed = jnp.zeros((1, LANES), jnp.float32).at[:, :d_out].set(
        bias.astype(jnp.float32))
    return w_packed, b_packed


def mnist_logistic_forward(x, w_packed, b_packed, d_out=10):
    """Forward pass of Mnist_Logistic: x @ weight.T + bias.

    x:        (B, 784) float32 (bf16 also accepted)
    w_packed: (784, 128) bfloat16  (from pack_linear_params)
    b_packed: (1, 128)   float32   (from pack_linear_params)
    returns   (B, d_out) float32
    """
    batch, d_in = x.shape
    tb = _choose_tb(batch)
    n_tiles = pl.cdiv(batch, tb)     # partial trailing tile handled by Mosaic

    out = pl.pallas_call(
        _linear_kernel,
        out_shape=jax.ShapeDtypeStruct((batch, LANES), jnp.bfloat16),
        grid_spec=pltpu.PrefetchScalarGridSpec(
            num_scalar_prefetch=0,
            grid=(n_tiles,),
            in_specs=[
                # Streamed activation tiles (double-buffered by Pallas).
                pl.BlockSpec((tb, d_in), lambda i: (i, 0)),
                # Weight / bias stay resident across all grid steps.
                pl.BlockSpec((d_in, LANES), lambda i: (0, 0)),
                pl.BlockSpec((1, LANES), lambda i: (0, 0)),
            ],
            out_specs=pl.BlockSpec((tb, LANES), lambda i: (i, 0)),
        ),
        compiler_params=pltpu.CompilerParams(
            dimension_semantics=("parallel",),
            vmem_limit_bytes=VMEM_LIMIT),
    )(x, w_packed, b_packed)

    # Tiny (B, 10) slice + cast back to f32 to match nn.Linear output dtype.
    return out[:, :d_out].astype(jnp.float32)


if __name__ == "__main__":
    key = jax.random.PRNGKey(0)
    k_x, k_w, k_b = jax.random.split(key, 3)

    B, D_out = 64, 10

    # nn.Linear init: U(-1/sqrt(in_features), 1/sqrt(in_features)).
    bound = 1.0 / math.sqrt(D_IN)
    weight = jax.random.uniform(k_w, (D_out, D_IN), jnp.float32, -bound, bound)
    bias = jax.random.uniform(k_b, (D_out,), jnp.float32, -bound, bound)

    # Synthetic MNIST-like batch of flattened 28x28 images.
    x = jax.random.uniform(k_x, (B, D_IN), jnp.float32, 0.0, 1.0)

    # One-time parameter packing (transpose + lane padding + bf16 cast).
    w_packed, b_packed = pack_linear_params(weight, bias)

    out = mnist_logistic_forward(x, w_packed, b_packed, d_out=D_out)
    out = jax.block_until_ready(out)

    # References: bf16-operand / f32-accum (matches kernel matmul numerics,
    # tolerance loosened slightly for the bf16 output store) and full-f32
    # (module semantics, loose tolerance for bf16 rounding).
    x_bf = x.astype(jnp.bfloat16).astype(jnp.float32)
    w_bf = weight.T.astype(jnp.bfloat16).astype(jnp.float32)
    ref_bf16 = x_bf @ w_bf + bias
    ref_f32 = x @ weight.T + bias

    assert out.shape == (B, D_out)
    assert out.dtype == jnp.float32
    assert jnp.allclose(out, ref_bf16, atol=2e-2, rtol=2e-2)
    assert jnp.allclose(out, ref_f32, atol=5e-2, rtol=5e-2)

    print("KERNEL_OK")
</pallas_src>

<mosaic_0001>
module attributes {stable_mosaic.version = 11 : i64} {
  func.func @_linear_kernel(%arg0: i32, %arg1: memref<32x784xf32, #tpu.memory_space<vmem>>, %arg2: memref<784x128xbf16, #tpu.memory_space<vmem>>, %arg3: memref<1x128xf32, #tpu.memory_space<vmem>>, %arg4: memref<32x128xbf16, #tpu.memory_space<vmem>>) attributes {dimension_semantics = [#tpu.dimension_semantics<parallel>], iteration_bounds = array<i64: 2>, scalar_prefetch = 0 : i64, scratch_operands = 0 : i64, tpu.core_type = #tpu.core_type<tc>, window_params = [{transform_indices = @transform_0, window_bounds = array<i64: 32, 784>}, {pipeline_mode = #tpu.pipeline_mode<synchronous>, transform_indices = @transform_1, window_bounds = array<i64: 784, 128>}, {pipeline_mode = #tpu.pipeline_mode<synchronous>, transform_indices = @transform_2, window_bounds = array<i64: 1, 128>}, {transform_indices = @transform_3, window_bounds = array<i64: 32, 128>}]} {
    %c0 = arith.constant 0 : index
    %c0_0 = arith.constant 0 : index
    %0 = vector.load %arg1[%c0, %c0_0] : memref<32x784xf32, #tpu.memory_space<vmem>>, vector<32x784xf32>
    %1 = arith.truncf %0 : vector<32x784xf32> to vector<32x784xbf16>
    %c0_1 = arith.constant 0 : index
    %c0_2 = arith.constant 0 : index
    %2 = vector.load %arg2[%c0_1, %c0_2] : memref<784x128xbf16, #tpu.memory_space<vmem>>, vector<784x128xbf16>
    %cst = arith.constant dense<0.000000e+00> : vector<32x128xf32>
    %3 = tpu.matmul %1, %2, %cst {dimension_numbers = #tpu.dot_dimension_numbers<[1], [0], [0], [1], [0, 0, 1, 1], [], []>} : vector<32x784xbf16>, vector<784x128xbf16>, vector<32x128xf32> -> vector<32x128xf32>
    %c0_3 = arith.constant 0 : index
    %c0_4 = arith.constant 0 : index
    %4 = vector.load %arg3[%c0_3, %c0_4] : memref<1x128xf32, #tpu.memory_space<vmem>>, vector<1x128xf32>
    %5 = vector.broadcast %4 : vector<1x128xf32> to vector<32x128xf32>
    %6 = arith.addf %3, %5 : vector<32x128xf32>
    %7 = arith.truncf %6 : vector<32x128xf32> to vector<32x128xbf16>
    %c0_5 = arith.constant 0 : index
    %c0_6 = arith.constant 0 : index
    %8 = vector.load %arg4[%c0_5, %c0_6] : memref<32x128xbf16, #tpu.memory_space<vmem>>, vector<32x128xbf16>
    tpu.vector_store %arg4[%c0_5, %c0_6], %7 {strides = array<i32>} : memref<32x128xbf16, #tpu.memory_space<vmem>>, vector<32x128xbf16>,
    return
  }
  func.func @transform_0(%arg0: i32) -> (i32, i32) {
    %c0_i32 = arith.constant 0 : i32
    %c0_i32_0 = arith.constant 0 : i32
    return %arg0, %c0_i32 : i32, i32
  }
  func.func @transform_1(%arg0: i32) -> (i32, i32) {
    %c0_i32 = arith.constant 0 : i32
    %c0_i32_0 = arith.constant 0 : i32
    %c0_i32_1 = arith.constant 0 : i32
    return %c0_i32, %c0_i32_0 : i32, i32
  }
  func.func @transform_2(%arg0: i32) -> (i32, i32) {
    %c0_i32 = arith.constant 0 : i32
    %c0_i32_0 = arith.constant 0 : i32
    %c0_i32_1 = arith.constant 0 : i32
    return %c0_i32, %c0_i32_0 : i32, i32
  }
  func.func @transform_3(%arg0: i32) -> (i32, i32) {
    %c0_i32 = arith.constant 0 : i32
    %c0_i32_0 = arith.constant 0 : i32
    return %arg0, %c0_i32 : i32, i32
  }
}

</mosaic_0001>

<bundles_post_ra>
// kernel: tpu_custom_call.1
= control target key start
LH: loop header
LB: loop body
LE: loop exit
PB: predicated region body
PF: predicated region fallthrough
CT: control target
= control target key end

     0   :  { %8 = vsyncpa [#allocation3], 0  ;;  %s1658_s0 = inlined_call_operand.hbm [shape: f32[64,784], index: 0, kind: input, shape index: {}]   ;;  %s1659_s1 = inlined_call_operand.hbm [shape: bf16[784,128], index: 1, kind: input, shape index: {}]   ;;  %s1660_s2 = inlined_call_operand.vmem [shape: f32[1,128], index: 2, kind: input, shape index: {}]   ;;  %s1661_s3 = inlined_call_operand.hbm [shape: bf16[64,128], index: 3, kind: output, shape index: {}]  }
   0x1   :  { %10 = vsyncpa [#allocation3 + $0x1], 0 }
   0x2   :  { %11 = vsyncpa [#allocation6], 0 }
   0x3   :  { %12 = vsyncpa [#allocation4], 0 }
   0x4   :  { %14 = vsyncpa [#allocation4 + $0x1], 0  ;;  %s1423_s12 = smov 0   ;;  %s1425_s13 = smov 0  }
   0x5   :  { %s1427_s14 = smov 0   ;;  %s1429_s15 = smov 0  }
   0x6 LB: > { %s1444_s16 = sadd.s32 4294967295, %s1392_s15   ;;  %s969_s17 = sadd.s32 4294967294, %s1392_s15   ;;  %s1392_s15 = sphi %s1429_s15, %s1681_s15   ;;  %s1388_s14 = sphi %s1427_s14, %s1680_s14   ;;  %s1384_s13 = sphi %s1425_s13, %s1679_s13   ;;  %s1380_s12 = sphi %s1423_s12, %s1678_s12  }
   0x7   : > { %p40_p0 = scmp.ne.s32.totalorder %s1384_s13, %s1380_s12  ;;  %p1662_p1 = scmp.eq.s32.totalorder %s1444_s16, 0 }
   0x8   : > { %p112_p3 = scmp.eq.s32.totalorder %s969_s17, 1  ;;  %p970_p5 = scmp.ge.s32.totalorder %s1392_s15, 1 }
   0x9   : > { %p1453_p4 = por %p1662_p1, %p40_p0  ;;  %p119_p7 = scmp.lt.s32.totalorder %s1392_s15, 3 }
   0xa   : > { %p1458_p6 = por %p112_p3, %p40_p0  ;;  %s1394_s21 = smov [#allocation5]  }
   0xb   : > { %s1665_s18 = scalar_select %p1453_p4, 1, 0 }
   0xc   : > { %s1666_s19 = scalar_select %p1458_p6, 1, 0 }
   0xd   : > { %p1463_p8 = pnand %p970_p5, %p119_p7  ;;  %s131_s22 = sshll.u32 %s1394_s21, 4  ;;  %s1467_s22 = int_to_ptr.vmem [resolvable:$true] %s131_s22 }
   0xe   : > { %s1479_s24 = sadd.s32 1, %s1392_s15   ;;  %s27_s25 = sadd.s32 1, %s1388_s14 }
   0xf   : > { %s1667_s20 = scalar_select %p1463_p8, 1, 0 }
  0x10   : > { %p1160_p9 = pneg %p1463_p8  ;;  %s24_s26 = ssub.s32 %s1392_s15, %s1479_s24 }
  0x11   : > { %s1264_s29 = scalar_lea.hbm %s1659_s1, 6272 }
  0x12   : > { %p1474_p11 = pnand %p1160_p9, %p1662_p1  ;;  %p1265_p12 = scmp.ne.s32.totalorder %s1659_s1, %s1264_s29 }
  0x13   : > { %p1271_p5 = scmp.lt.u32.totalorder %s1264_s29, %s1659_s1 }
  0x14   : > { %p1266_p13 = pneg %p1474_p11 }
  0x16   : > { %p1267_p0 = pnand %p1266_p13, %p1265_p12 }
  0x18   : > { %p1268_p3 = pneg %p1267_p0 }
  0x1a   : > { %p1273_p7 = pnand %p1271_p5, %p1268_p3 }
  0x1c   : > { %1276 = shalt.err (!%p1273_p7)
}
  0x1d   : > { %s1277_s7 = scalar_lea.vmem %s1467_s22, 6272  ;;  %p1285_p2 = scmp.lt.s32.totalorder %s1467_s22, %s1467_s22 }
  0x1e   : > { %p1278_p9 = scmp.ne.s32.totalorder %s1467_s22, %s1277_s7  ;;  %p1286_p6 = scmp.lt.s32.totalorder %s1277_s7, %s1277_s7 }
  0x20   : > { %p1280_p10 = pnand %p1278_p9, %p1266_p13  ;;  %p1287_p4 = por %p1286_p6, %p1285_p2 }
  0x22   : > { %p1281_p1 = pneg %p1280_p10 }
  0x24   : > { %p1288_p8 = pnand %p1287_p4, %p1281_p1 }
  0x26   : > { %1291 = shalt.err (!%p1288_p8)
}
  0x27   : > { %s1395_s8 = smov 64   ;;  %s1396_s9 = smov 4  }
  0x28   : > { %1163 = dma.hbm_to_vmem [thread:$0]  (!%p1474_p11), %s1659_s1, 6272, %s1467_s22, [#allocation6], %s1395_s8, %s1395_s8, %s1396_s9  }
  0x29   : > { %p25_p2 = scmp.eq.s32.totalorder %s24_s26, 0  ;;  %p34_p1 = scmp.ne.s32.totalorder %s1388_s14, %s1384_s13 }
  0x2a   : > { %p35_p4 = scmp.eq.s32.totalorder %s1392_s15, 0  ;;  %p1173_p6 = scmp.lt.s32.totalorder %s1392_s15, 2 }
  0x2b   : > { %s1510_s17 = scalar_select %p25_p2, %s1388_s14, %s27_s25  }
  0x2c   : > { %p36_p8 = por %p35_p4, %p34_p1  ;;  %p1669_p10 = scmp.eq.s32.totalorder %s1444_s16, 1 }
  0x2d   : > { %s148_s27 = sand.u32 1, %s1388_s14   ;;  %s1150_s28 = smul.u32 3584, %s1392_s15 }
  0x2e   : > { %p1514_p12 = por %p1669_p10, %p34_p1  ;;  %s1149_s29 = smul.u32 224, %s148_s27 }
  0x2f   : > { %s1523_s4 = scalar_lea.hbm %s1658_s0, %s1150_s28  ;;  %p1525_p11 = pnand %p1173_p6, %p36_p8 }
  0x30   : > { %s152_s25 = scalar_lea.vmem [#allocation2], %s1149_s29  ;;  %s1531_s5 = scalar_lea.sflag [#allocation3], %s148_s27 }
  0x31   : > { %s160_s26 = sshll.u32 %s152_s25, 4  ;;  %s1292_s6 = scalar_lea.hbm %s1523_s4, 3584  ;;  %s1529_s26 = int_to_ptr.vmem [resolvable:$true] %s160_s26 }
  0x32   : > { %p1293_p13 = scmp.ne.s32.totalorder %s1523_s4, %s1292_s6  ;;  %p1294_p0 = pneg %p1525_p11 }
  0x33   : > { %s1297_s9 = scalar_lea.hbm %s1658_s0, 7168  ;;  %p1298_p7 = scmp.lt.u32.totalorder %s1523_s4, %s1658_s0 }
  0x34   : > { %p1295_p3 = pnand %p1294_p0, %p1293_p13  ;;  %p1299_p9 = scmp.lt.u32.totalorder %s1297_s9, %s1292_s6 }
  0x35   : > { %p1301_p1 = scmp.lt.u32.totalorder %s1292_s6, %s1523_s4 }
  0x36   : > { %p1296_p5 = pneg %p1295_p3  ;;  %p1300_p2 = por %p1299_p9, %p1298_p7 }
  0x38   : > { %p1302_p4 = por %p1301_p1, %p1300_p2 }
  0x3a   : > { %p1303_p6 = pnand %p1302_p4, %p1296_p5 }
  0x3c   : > { %1306 = shalt.err (!%p1303_p6)
}
  0x3d   : > { %s1307_s27 = scalar_lea.vmem %s1529_s26, 3584  ;;  %s1397_s28 = smov [#allocation2]  }
  0x3e   : > { %p1308_p8 = scmp.ne.s32.totalorder %s1529_s26, %s1307_s27  ;;  %s1312_s29 = sshll.u32 %s1397_s28, 4  ;;  %s1313_s29 = int_to_ptr.vmem [resolvable:$false] %s1312_s29 }
  0x3f   : > { %s1314_s23 = scalar_lea.vmem %s1313_s29, 7168  ;;  %p1315_p3 = scmp.lt.s32.totalorder %s1529_s26, %s1313_s29 }
  0x40   : > { %p1310_p10 = pnand %p1308_p8, %p1294_p0  ;;  %p1316_p7 = scmp.lt.s32.totalorder %s1314_s23, %s1307_s27 }
  0x42   : > { %p1311_p13 = pneg %p1310_p10  ;;  %p1317_p9 = por %p1316_p7, %p1315_p3 }
  0x44   : > { %p1318_p2 = pnand %p1317_p9, %p1311_p13 }
  0x46   : > { %1321 = shalt.err (!%p1318_p2)
}
  0x47   : > { %s1398_s30 = smov 896   ;;  %s1399_s25 = smov 56  }
  0x48   : > { %1167 = dma.hbm_to_vmem [thread:$0]  (!%p1525_p11), %s1523_s4, 3584, %s1529_s26, %s1531_s5, %s1398_s30, %s1398_s30, %s1399_s25  }
  0x49   : > { %p1672_p0 = scmp.ne.s32.totalorder %s1667_s20, 0 }
  0x4a   : > { %s1562_s6 = sand.u32 (!%p1672_p0), 1, %s1384_s13   ;;  %p1673_p5 = scmp.ne.s32.totalorder (!%p1672_p0), %s1665_s18, 0 }
  0x4b   : > { %172 = sbr.rel (%p1672_p0) target bundleno = 397 (0x18d), region = 32  ;;  %s175_s8 = scalar_lea.sflag (!%p1672_p0), [#allocation3], %s1562_s6 }
  0x4c   : > { %s1151_s7 = smul.u32 (!%p1672_p0), 224, %s1562_s6 }
  0x4e   : > { %s1566_s9 = scalar_lea.vmem (!%p1672_p0), [#allocation2], %s1151_s7 }
  0x52   : > { %1367 = dma.done.wait (%p1673_p5), %s175_s8, 3584  }
  0x53   : > { %1369 = vsyncadd (%p1673_p5), %s175_s8, 4294963712  ;;  %p1674_p11 = scmp.eq.s32.totalorder %s1444_s16, 0 }
  0x55   : > { %1371 = dma.done.wait (%p1674_p11), [#allocation6], 6272   ;;  %p1675_p1 = pmov %p1674_p11 }
  0x56   : > { %v1215_v0 = vld [vmem:[#allocation5 + $0x40] sm:$0xff]   ;;  %v1219_v4 = vld [vmem:[#allocation5 + $0x48] sm:$0xff]   ;;  %v1223_v8 = vld [vmem:[#allocation5 + $0x50] sm:$0xff]   ;;  %vm649_vm0 = vcmask 130048   ;;  %s978_s4 = sshll.u32 %s1562_s6, 4  ;;  %s1044_s5 = sshll.u32 %s1444_s16, 8 }
  0x57   : > { %1373 = vsyncadd (%p1675_p1), [#allocation6], 4294961024  ;;  %v1216_v1 = vld [vmem:[#allocation5] sm:$0xff]   ;;  %1056 = vmatprep.subr.bf16.mxu0 %v1215_v0  ;;  %v1220_v5 = vld [vmem:[#allocation5 + $0x8] sm:$0xff]   ;;  %s204_s22 = scalar_lea.vmem [#allocation7], %s978_s4  ;;  %s1614_s27 = scalar_lea.hbm %s1661_s3, %s1044_s5 }
  0x58   : > { %v1217_v2 = vld [vmem:[#allocation5 + $0xc0] sm:$0xff]   ;;  %1057 = vmatpush3.bf16.msra.mxu0 %v1216_v1  ;;  %v1221_v6 = vld [vmem:[#allocation5 + $0xc8] sm:$0xff]   ;;  %v1224_v9 = vld [vmem:[#allocation5 + $0x10] sm:$0xff]   ;;  %s886_s26 = sshll.u32 %s204_s22, 4  ;;  %s873_s28 = scalar_lea.sflag [#allocation4], %s1562_s6  ;;  %s1609_s26 = int_to_ptr.vmem [resolvable:$true] %s886_s26 }
  0x59   : > { %v1218_v3 = vld [vmem:[#allocation5 + $0x80] sm:$0xff]   ;;  %1084 = vmatprep.subr.bf16.mxu1 %v1217_v2  ;;  %1058 = vmatprep.subr.bf16.mxu0 %v1219_v4  ;;  %v1222_v7 = vld [vmem:[#allocation5 + $0x88] sm:$0xff]   ;;  %v1225_v10 = vld [vmem:[#allocation5 + $0xd0] sm:$0xff]   ;;  %s1322_s29 = scalar_lea.vmem %s1609_s26, 256  ;;  %s1400_s16 = smov [#allocation7]  }
  0x5a   : > { %1085 = vmatpush3.bf16.msra.mxu1 %v1218_v3  ;;  %v1226_v11 = vld [vmem:[#allocation5 + $0x90] sm:$0xff]   ;;  %v1227_v12 = vld [vmem:[#allocation5 + $0x58] sm:$0xff]   ;;  %v1231_v16 = vld [vmem:[#allocation5 + $0x60] sm:$0xff]   ;;  %p1323_p4 = scmp.ne.s32.totalorder %s1609_s26, %s1322_s29  ;;  %s1326_s23 = sshll.u32 %s1400_s16, 4  ;;  %s1327_s23 = int_to_ptr.vmem [resolvable:$false] %s1326_s23 }
  0x5b   : > { %1086 = vmatprep.subr.bf16.mxu1 %v1221_v6  ;;  %v1228_v13 = vld [vmem:[#allocation5 + $0x18] sm:$0xff]   ;;  %v1232_v17 = vld [vmem:[#allocation5 + $0x20] sm:$0xff]   ;;  %v1235_v20 = vld [vmem:[#allocation5 + $0x68] sm:$0xff]   ;;  %s1328_s30 = scalar_lea.vmem %s1327_s23, 512  ;;  %p1329_p10 = scmp.lt.s32.totalorder %s1609_s26, %s1327_s23 }
  0x5c   : > { %1059 = vmatpush3.bf16.msra.mxu0 %v1220_v5  ;;  %v1229_v14 = vld [vmem:[#allocation5 + $0xd8] sm:$0xff]   ;;  %v1233_v18 = vld [vmem:[#allocation5 + $0xe0] sm:$0xff]   ;;  %v1236_v21 = vld [vmem:[#allocation5 + $0x28] sm:$0xff]   ;;  %p1324_p6 = pnand %p1323_p4, %p1514_p12  ;;  %p1330_p13 = scmp.lt.s32.totalorder %s1328_s30, %s1322_s29 }
  0x5d   : > { %1060 = vmatprep.subr.bf16.mxu0 %v1223_v8  ;;  %v1230_v15 = vld [vmem:[#allocation5 + $0x98] sm:$0xff]   ;;  %v1234_v19 = vld [vmem:[#allocation5 + $0xa0] sm:$0xff]   ;;  %v1237_v22 = vld [vmem:[#allocation5 + $0xe8] sm:$0xff]  }
  0x5e   : > { %1087 = vmatpush3.bf16.msra.mxu1 %v1222_v7  ;;  %v1238_v23 = vld [vmem:[#allocation5 + $0xa8] sm:$0xff]   ;;  %v1239_v24 = vld [vmem:[#allocation5 + $0x70] sm:$0xff]   ;;  %v1243_v28 = vld [vmem:[#allocation5 + $0x78] sm:$0xff]   ;;  %p1325_p8 = pneg %p1324_p6  ;;  %p1331_p3 = por %p1330_p13, %p1329_p10 }
  0x5f   : > { %1088 = vmatprep.subr.bf16.mxu1 %v1225_v10  ;;  %v1240_v25 = vld [vmem:[#allocation5 + $0x30] sm:$0xff]   ;;  %v1244_v29 = vld [vmem:[#allocation5 + $0x38] sm:$0xff]   ;;  %v209_v31 = vld [vmem:[%s1566_s9 + $0x8] sm:$0xff] }
  0x60   : > { %1061 = vmatpush3.bf16.msra.mxu0 %v1224_v9  ;;  %v1241_v26 = vld [vmem:[#allocation5 + $0xf0] sm:$0xff]   ;;  %v1245_v30 = vld [vmem:[#allocation5 + $0xf8] sm:$0xff]   ;;  %v216_v32 = vld [vmem:[%s1566_s9 + $0x40] sm:$0xff]  ;;  %p1332_p7 = pnand %p1331_p3, %p1325_p8 }
  0x61   : > { %1062 = vmatprep.subr.bf16.mxu0 %v1227_v12  ;;  %v1242_v27 = vld [vmem:[#allocation5 + $0xb0] sm:$0xff]   ;;  %v237_v33 = vpack.c.bf16 %v216_v32, %v209_v31  ;;  %v1246_v34 = vld [vmem:[#allocation5 + $0xb8] sm:$0xff]   ;;  %v208_v35 = vld [vmem:[%s1566_s9] sm:$0xff] }
  0x62   : > { %1089 = vmatpush3.bf16.msra.mxu1 %v1226_v11  ;;  %v215_v36 = vld [vmem:[%s1566_s9 + $0x38] sm:$0xff]  ;;  %v1247_v38 = vld [vmem:[#allocation5 + $0x140] sm:$0xff]   ;;  %v218_v40 = vld [vmem:[%s1566_s9 + $0x50] sm:$0xff] }
  0x63   : > { %1090 = vmatprep.subr.bf16.mxu1 %v1229_v14  ;;  %688 = vmatprep.mubr.bf16.mxu0 %v237_v33  ;;  %v236_v37 = vpack.c.bf16 %v215_v36, %v208_v35  ;;  %v211_v39 = vld [vmem:[%s1566_s9 + $0x18] sm:$0xff]  ;;  %v1248_v42 = vld [vmem:[#allocation5 + $0x100] sm:$0xff]   ;;  %v210_v43 = vld [vmem:[%s1566_s9 + $0x10] sm:$0xff] }
  0x64   : > { %1063 = vmatpush3.bf16.msra.mxu0 %v1228_v13  ;;  %v239_v41 = vpack.c.bf16 %v218_v40, %v211_v39  ;;  %v217_v44 = vld [vmem:[%s1566_s9 + $0x48] sm:$0xff]  ;;  %v1251_v48 = vld [vmem:[#allocation5 + $0x150] sm:$0xff]   ;;  %v1253_v50 = vld [vmem:[#allocation5 + $0x158] sm:$0xff]  }
  0x65   : > { %1064 = vmatprep.subr.bf16.mxu0 %v1231_v16  ;;  %v238_v45 = vpack.c.bf16 %v217_v44, %v210_v43  ;;  %v1249_v46 = vld [vmem:[#allocation5 + $0x148] sm:$0xff]   ;;  %v1252_v49 = vld [vmem:[#allocation5 + $0x110] sm:$0xff]   ;;  %v1254_v51 = vld [vmem:[#allocation5 + $0x118] sm:$0xff]  }
  0x66   : > { %1091 = vmatpush3.bf16.msra.mxu1 %v1230_v15  ;;  %737 = vmatprep.mubr.bf16.mxu1 %v239_v41  ;;  %v1250_v47 = vld [vmem:[#allocation5 + $0x108] sm:$0xff]   ;;  %v223_v52 = vld [vmem:[%s1566_s9 + $0x78] sm:$0xff]  ;;  %v230_v53 = vld [vmem:[%s1566_s9 + $0xb0] sm:$0xff] }
  0x67   : > { %1092 = vmatprep.subr.bf16.mxu1 %v1233_v18  ;;  %v1255_v54 = vld [vmem:[#allocation5 + $0x160] sm:$0xff]   ;;  %v244_v55 = vpack.c.bf16 %v230_v53, %v223_v52  ;;  %v222_v56 = vld [vmem:[%s1566_s9 + $0x70] sm:$0xff]  ;;  %v229_v57 = vld [vmem:[%s1566_s9 + $0xa8] sm:$0xff] }
  0x68   : > { %1065 = vmatpush3.bf16.msra.mxu0 %v1232_v17  ;;  %v1256_v58 = vld [vmem:[#allocation5 + $0x120] sm:$0xff]   ;;  %v243_v59 = vpack.c.bf16 %v229_v57, %v222_v56  ;;  %v225_v60 = vld [vmem:[%s1566_s9 + $0x88] sm:$0xff]  ;;  %v231_v0 = vld [vmem:[%s1566_s9 + $0xb8] sm:$0xff] }
  0x69   : > { %1066 = vmatprep.subr.bf16.mxu0 %v1235_v20  ;;  %v232_v61 = vld [vmem:[%s1566_s9 + $0xc0] sm:$0xff]  ;;  %v1257_v1 = vld [vmem:[#allocation5 + $0x168] sm:$0xff]   ;;  %v1259_v5 = vld [vmem:[#allocation5 + $0x170] sm:$0xff]  }
  0x6a   : > { %1093 = vmatpush3.bf16.msra.mxu1 %v1234_v19  ;;  %v224_v62 = vld [vmem:[%s1566_s9 + $0x80] sm:$0xff]  ;;  %v246_v63 = vpack.c.bf16 %v232_v61, %v225_v60  ;;  %v1258_v4 = vld [vmem:[#allocation5 + $0x128] sm:$0xff]   ;;  %v214_v9 = vld [vmem:[%s1566_s9 + $0x30] sm:$0xff] }
  0x6b   : > { %1094 = vmatprep.subr.bf16.mxu1 %v1237_v22  ;;  %v245_v2 = vpack.c.bf16 %v231_v0, %v224_v62  ;;  %v1261_v3 = vld [vmem:[#allocation5 + $0x180] sm:$0xff]   ;;  %v213_v6 = vld [vmem:[%s1566_s9 + $0x28] sm:$0xff]  ;;  %v235_v12 = vld [vmem:[%s1566_s9 + $0xd8] sm:$0xff] }
  0x6c   : > { %1067 = vmatpush3.bf16.msra.mxu0 %v1236_v21  ;;  %v220_v7 = vld [vmem:[%s1566_s9 + $0x60] sm:$0xff]  ;;  %v221_v10 = vld [vmem:[%s1566_s9 + $0x68] sm:$0xff]  ;;  %v1260_v13 = vld [vmem:[#allocation5 + $0x130] sm:$0xff]  }
  0x6d   : > { %1068 = vmatprep.subr.bf16.mxu0 %v1239_v24  ;;  %v241_v8 = vpack.c.bf16 %v220_v7, %v213_v6  ;;  %v228_v11 = vld [vmem:[%s1566_s9 + $0xa0] sm:$0xff]  ;;  %v242_v14 = vpack.c.bf16 %v221_v10, %v214_v9  ;;  %v1262_v16 = vld [vmem:[#allocation5 + $0x178] sm:$0xff]   ;;  %v234_v21 = vld [vmem:[%s1566_s9 + $0xd0] sm:$0xff] }
  0x6e   : > { %1095 = vmatpush3.bf16.msra.mxu1 %v1238_v23  ;;  %v249_v15 = vpack.c.bf16 %v235_v12, %v228_v11  ;;  %v1263_v17 = vld [vmem:[#allocation5 + $0x138] sm:$0xff]   ;;  %v212_v18 = vld [vmem:[%s1566_s9 + $0x20] sm:$0xff]  ;;  %v226_v24 = vld [vmem:[%s1566_s9 + $0x90] sm:$0xff] }
  0x6f   : > { %1096 = vmatprep.subr.bf16.mxu1 %v1241_v26  ;;  %v219_v19 = vld [vmem:[%s1566_s9 + $0x58] sm:$0xff] }
  0x70   : > { %1069 = vmatpush3.bf16.msra.mxu0 %v1240_v25  ;;  %v227_v20 = vld [vmem:[%s1566_s9 + $0x98] sm:$0xff]  ;;  %v240_v22 = vpack.c.bf16 %v219_v19, %v212_v18  ;;  %v233_v25 = vld [vmem:[%s1566_s9 + $0xc8] sm:$0xff] }
  0x71   : > { %1070 = vmatprep.subr.bf16.mxu0 %v1243_v28  ;;  %v248_v23 = vpack.c.bf16 %v234_v21, %v227_v20  ;;  %v247_v26 = vpack.c.bf16 %v233_v25, %v226_v24  ;;  %v979_v28 = vld [vmem:[%s1660_s2] ss:$0 sm:$0xff] }
  0x72   : > { %1097 = vmatpush3.bf16.msra.mxu1 %v1242_v27 }
  0x73   : > { %1098 = vmatprep.subr.bf16.mxu1 %v1245_v30 }
  0x74   : > { %1071 = vmatpush3.bf16.msra.mxu0 %v1244_v29 }
  0x75   : > { %1112 = vmatprep.subr.bf16.mxu0 %v1247_v38 }
  0x76   : > { %1099 = vmatpush3.bf16.msra.mxu1 %v1246_v34 }
  0x77   : > { %689 = vmatmul.mubr.bf16.vlgmr.msra.gmra.mrb[0].mxu0 %v236_v37  ;;  %1143 = vmatprep.subr.bf16.mxu1 %v1261_v3 }
  0x78   : > { %1113 = vmatpush3.bf16.msra.mxu0 %v1248_v42  ;;  %696 = vmatprep.mubr.bf16.mxu0 %v244_v55 }
  0x79   : > { %738 = vmatmul.mubr.bf16.vlgmr.msra.gmra.mrb[0].mxu1 %v238_v45  ;;  %1114 = vmatprep.subr.bf16.mxu0 %v1249_v46 }
  0x7a   : > { %745 = vmatprep.mubr.bf16.mxu1 %v246_v63  ;;  %1144 = vmatpush3.bf16.msra.mxu1 %v1261_v3 }
  0x7c   : > { %1115 = vmatpush3.bf16.msra.mxu0 %v1250_v47 }
  0x7d   : > { %1116 = vmatprep.subr.bf16.mxu0 %v1251_v48 }
  0x7f   : > { %697 = vmatmul.mubr.bf16.gmra.mrb[4].mxu0 %v243_v59 }
  0x80   : > { %1117 = vmatpush3.bf16.msra.mxu0 %v1252_v49  ;;  %786 = vmatprep.mubr.bf16.mxu0 %v241_v8 }
  0x81   : > { %1118 = vmatprep.subr.bf16.mxu0 %v1253_v50  ;;  %746 = vmatmul.mubr.bf16.gmra.mrb[4].mxu1 %v245_v2 }
  0x82   : > { %1145 = vmatprep.mubr.msk.bf16.mxu1 %vm649_vm0, %v242_v14 }
  0x84   : > { %1119 = vmatpush3.bf16.msra.mxu0 %v1254_v51 }
  0x85   : > { %1120 = vmatprep.subr.bf16.mxu0 %v1255_v54 }
  0x88   : > { %1121 = vmatpush3.bf16.msra.mxu0 %v1256_v58 }
  0x89   : > { %1122 = vmatprep.subr.bf16.mxu0 %v1257_v1  ;;  %1146 = vmatmul.mubr.msk.bf16.vlgmr.msra.gmra.mrb[8].mxu1 %vm649_vm0, %v249_v15 }
  0x8c   : > { %1123 = vmatpush3.bf16.msra.mxu0 %v1258_v4 }
  0x8d   : > { %1124 = vmatprep.subr.bf16.mxu0 %v1259_v5 }
  0x90   : > { %1125 = vmatpush3.bf16.msra.mxu0 %v1260_v13 }
  0x91   : > { %1126 = vmatprep.subr.bf16.mxu0 %v1262_v16 }
  0x94   : > { %1127 = vmatpush3.bf16.msra.mxu0 %v1263_v17 }
  0x97   : > { %787 = vmatmul.mubr.bf16.vlgmr.msra.gmra.mrb[8].mxu0 %v240_v22 }
  0x98   : > { %794 = vmatprep.mubr.bf16.mxu0 %v248_v23 }
  0x9f   : > { %795 = vmatmul.mubr.bf16.gmra.mrb[12].mxu0 %v247_v26 }
 0x14a   : > { %v1072_v27 = vpop.f32.mrb[0].mxu0 }
 0x14b   : > { %v1073_v29 = vpop.f32.mrb[1].mxu0 }
 0x14c   : > { %v1074_v30 = vadd.f32 %v1073_v29, %v1072_v27  ;;  %v1075_v31 = vpop.f32.mrb[2].mxu0  ;;  %v1100_v32 = vpop.f32.mrb[0].mxu1 }
 0x14d   : > { %v1076_v33 = vpop.f32.mrb[3].mxu0  ;;  %v1101_v36 = vpop.f32.mrb[1].mxu1 }
 0x14e   : > { %v691_v34 = vadd.f32 %v1074_v30, %v979_v28  ;;  %v1077_v35 = vadd.f32 %v1076_v33, %v1075_v31  ;;  %v1102_v37 = vadd.f32 %v1101_v36, %v1100_v32  ;;  %v1103_v38 = vpop.f32.mrb[2].mxu1 }
 0x14f   : > { %v1104_v40 = vpop.f32.mrb[3].mxu1 }
 0x150   : > { %v694_v39 = vadd.f32 %v1077_v35, %v979_v28  ;;  %v740_v41 = vadd.f32 %v1102_v37, %v691_v34  ;;  %v1105_v42 = vadd.f32 %v1104_v40, %v1103_v38 }
 0x152   : > { %v743_v43 = vadd.f32 %v1105_v42, %v694_v39  ;;  %v1078_v44 = vpop.f32.mrb[4].mxu0 }
 0x153   : > { %v1079_v45 = vpop.f32.mrb[5].mxu0 }
 0x154   : > { %v1080_v46 = vadd.f32 %v1079_v45, %v1078_v44  ;;  %v1081_v47 = vpop.f32.mrb[6].mxu0  ;;  %v1106_v48 = vpop.f32.mrb[4].mxu1 }
 0x155   : > { %v1082_v49 = vpop.f32.mrb[7].mxu0  ;;  %v1107_v50 = vpop.f32.mrb[5].mxu1 }
 0x156   : > { %v699_v51 = vadd.f32 %v1080_v46, %v979_v28  ;;  %v1083_v52 = vadd.f32 %v1082_v49, %v1081_v47  ;;  %v1108_v53 = vadd.f32 %v1107_v50, %v1106_v48  ;;  %v1109_v54 = vpop.f32.mrb[6].mxu1 }
 0x157   : > { %v1110_v55 = vpop.f32.mrb[7].mxu1 }
 0x158   : > { %v702_v56 = vadd.f32 %v1083_v52, %v979_v28  ;;  %v748_v57 = vadd.f32 %v1108_v53, %v699_v51  ;;  %v1111_v58 = vadd.f32 %v1110_v55, %v1109_v54 }
 0x15a   : > { %v751_v59 = vadd.f32 %v1111_v58, %v702_v56 }
 0x15c   : > { %v1147_v60 = vpop.f32.mrb[8].mxu1 }
 0x15d   : > { %v837_v61 = vpop.f32.mrb[9].mxu1 }
 0x15e   : > { %v1148_v62 = vpop.f32.mrb[10].mxu1 }
 0x15f   : > { %v840_v63 = vpop.f32.mrb[11].mxu1 }
 0x16a   : > { %v1128_v0 = vpop.f32.mrb[8].mxu0 }
 0x16b   : > { %v1129_v1 = vpop.f32.mrb[9].mxu0 }
 0x16c   : > { %v1130_v2 = vadd.f32 %v1129_v1, %v1128_v0  ;;  %v1131_v3 = vpop.f32.mrb[10].mxu0 }
 0x16d   : > { %v1132_v4 = vpop.f32.mrb[11].mxu0 }
 0x16e   : > { %v1133_v5 = vadd.f32 %v1132_v4, %v1131_v3  ;;  %v789_v6 = vadd.f32 %v1130_v2, %v740_v41 }
 0x170   : > { %v838_v7 = vadd.f32 %v837_v61, %v789_v6  ;;  %v792_v8 = vadd.f32 %v1133_v5, %v743_v43 }
 0x172   : > { %v841_v9 = vadd.f32 %v840_v63, %v792_v8  ;;  %v1134_v10 = vpop.f32.mrb[12].mxu0 }
 0x173   : > { %v1135_v11 = vpop.f32.mrb[13].mxu0 }
 0x174   : > { %v1048_v12 = vpack.c.bf16 %v841_v9, %v838_v7  ;;  %v1136_v13 = vadd.f32 %v1135_v11, %v1134_v10  ;;  %v1137_v14 = vpop.f32.mrb[14].mxu0 }
 0x175   : > { %v1138_v15 = vpop.f32.mrb[15].mxu0 }
 0x176   : > { %1049 = vst [vmem:[%s204_s22] sm:$0xff] %v1048_v12   ;;  %v797_v16 = vadd.f32 %v1136_v13, %v748_v57  ;;  %v1139_v17 = vadd.f32 %v1138_v15, %v1137_v14 }
 0x178   : > { %v846_v18 = vadd.f32 %v1147_v60, %v797_v16  ;;  %v800_v19 = vadd.f32 %v1139_v17, %v751_v59 }
 0x17a   : > { %v849_v20 = vadd.f32 %v1148_v62, %v800_v19 }
 0x17c   : > { %v1053_v21 = vpack.c.bf16 %v849_v20, %v846_v18 }
 0x17e   : > { %1055 = vst [vmem:[%s204_s22 + $0x8] sm:$0xff] %v1053_v21  }
 0x17f   : > { %1335 = shalt.err (!%p1332_p7)
}
 0x180   : > { %s1336_s25 = scalar_lea.hbm %s1614_s27, 256  ;;  %s1340_s9 = scalar_lea.hbm %s1661_s3, 512 }
 0x181   : > { %p1337_p9 = scmp.ne.s32.totalorder %s1614_s27, %s1336_s25  ;;  %p1341_p5 = scmp.lt.u32.totalorder %s1614_s27, %s1661_s3 }
 0x182   : > { %p1342_p11 = scmp.lt.u32.totalorder %s1340_s9, %s1336_s25  ;;  %p1344_p4 = scmp.lt.u32.totalorder %s1336_s25, %s1614_s27 }
 0x183   : > { %p1338_p2 = pnand %p1337_p9, %p1514_p12 }
 0x184   : > { %p1343_p1 = por %p1342_p11, %p1341_p5 }
 0x185   : > { %p1339_p0 = pneg %p1338_p2 }
 0x186   : > { %p1345_p6 = por %p1344_p4, %p1343_p1 }
 0x188   : > { %p1346_p8 = pnand %p1345_p6, %p1339_p0 }
 0x18a   : > { %1349 = shalt.err (!%p1346_p8)
}
 0x18b   : > { %s1401_s4 = smov 64   ;;  %s1402_s22 = smov 4  }
 0x18c   : > { %1158 = dma.vmem_to_hbm [thread:$0]  (%p1514_p12), %s1609_s26, 256, %s1614_s27, %s873_s28, %s1401_s4, %s1401_s4, %s1402_s22  }
 0x18d PF: > { %s901_s5 = sand.u32 1, %s1380_s12   ;;  %p1676_p10 = scmp.ne.s32.totalorder %s1666_s19, 0 }
 0x18e   : > { %p1677_p13 = scmp.ge.s32.totalorder %s1392_s15, 2  ;;  %s902_s10 = scalar_lea.sflag [#allocation4], %s901_s5 }
 0x190   : > { %p1169_p3 = pnand %p1677_p13, %p1676_p10 }
 0x192   : > { %1375 = dma.done.wait (!%p1169_p3), %s902_s10, 256  }
 0x193   : > { %1377 = vsyncadd (!%p1169_p3), %s902_s10, 4294967040  ;;  %p17_p7 = scmp.ge.s32.totalorder %s1479_s24, 4   ;;  %s1678_s12 = smov %s1384_s13 }
 0x194   : > { %s1679_s13 = smov %s1388_s14  ;;  %s1680_s14 = smov %s1510_s17 }
 0x195   : > { %s1681_s15 = smov %s1479_s24  ;;  %19 = sbr.rel (!%p17_p7) target bundleno = 6 (0x6), region = 81 }
 0x19c   :  { %907 = vsyncpa [#allocation3], 1 }
 0x19d   :  { %909 = vsyncpa [#allocation3 + $0x1], 1 }
 0x19e   :  { %910 = vsyncpa [#allocation6], 1 }
 0x19f   :  { %911 = vsyncpa [#allocation4], 1 }
 0x1a0   :  { %913 = vsyncpa [#allocation4 + $0x1], 1 }

</bundles_post_ra>
